<compile_context>
chip_gen: v7x
topology: tpu7x:2x2x1
jax: 0.10.0
libtpu: 0.0.40
codegen_flags: <defaults>
</compile_context>

<pallas_src>
import functools

import jax
import jax.numpy as jnp
from jax import lax
from jax.experimental import pallas as pl
from jax.experimental.pallas import tpu as pltpu


# ----------------------------------------------------------------------------
# Shared in-kernel math
# ----------------------------------------------------------------------------
def _apply_gates(gates, c_prev, hidden):
    """PyTorch LSTMCell gate math. gates: (B, 4H) f32 in (i, f, g, o) order."""
    H = hidden
    # Activate the whole (B, 4H) vreg at once; select tanh only for the g gate
    # via a lane mask (avoids 4 separate EUP ops on 32-lane slices).
    lane = lax.broadcasted_iota(jnp.int32, gates.shape, 1)
    is_g = jnp.logical_and(lane >= 2 * H, lane < 3 * H)
    act = jnp.where(is_g, jnp.tanh(gates), jax.nn.sigmoid(gates))

    i_g = act[:, 0 * H:1 * H]
    f_g = act[:, 1 * H:2 * H]
    g_g = act[:, 2 * H:3 * H]
    o_g = act[:, 3 * H:4 * H]

    c_new = f_g * c_prev + i_g * g_g
    h_new = o_g * jnp.tanh(c_new)
    return h_new, c_new


def _lstm_forward(x, h0, c0, h1, c1, w1, w2, b12, wout, bout, hidden):
    """One full module step on VMEM-resident values.

    w1: (I+H, 4H) = [W_ih1; W_hh1]^T, w2: (2H, 4H) = [W_ih2; W_hh2]^T,
    b12: (2, 4H) = [b_ih1+b_hh1 ; b_ih2+b_hh2], wout: (H, C), bout: (1, C).
    """
    cdt = w1.dtype  # matmul operand dtype (f32 default, bf16 optional)

    # ---- layer-1 LSTM cell: single fused matmul [x | h0] @ [Wih; Whh] ----
    lhs1 = jnp.concatenate([x, h0], axis=1).astype(cdt)
    gates1 = jnp.dot(lhs1, w1, preferred_element_type=jnp.float32) + b12[0:1, :]
    hid1, c1n = _apply_gates(gates1, c0, hidden)

    # ---- layer-2 LSTM cell: single fused matmul [hid1 | h1] @ [Wih; Whh] ----
    lhs2 = jnp.concatenate([hid1, h1], axis=1).astype(cdt)
    gates2 = jnp.dot(lhs2, w2, preferred_element_type=jnp.float32) + b12[1:2, :]
    hid2, c2n = _apply_gates(gates2, c1, hidden)

    # ---- output Linear ----
    out = jnp.dot(hid2.astype(cdt), wout, preferred_element_type=jnp.float32) + bout
    return out, hid1, c1n, hid2, c2n


# ----------------------------------------------------------------------------
# Single-step kernel (faithful to the module's forward signature)
# ----------------------------------------------------------------------------
def wifi_lstm_step_kernel(
    x_ref, h0_ref, c0_ref, h1_ref, c1_ref,
    w1_ref, w2_ref, b12_ref, wout_ref, bout_ref,
    out_ref, states_ref, *, hidden,
):
    out, hid1, c1n, hid2, c2n = _lstm_forward(
        x_ref[...], h0_ref[...], c0_ref[...], h1_ref[...], c1_ref[...],
        w1_ref[...], w2_ref[...], b12_ref[...], wout_ref[...], bout_ref[...],
        hidden,
    )
    out_ref[...] = out.astype(out_ref.dtype)
    # Lane-dense (B, 4H) slab: [hid1 | c1n | hid2 | c2n] -> one unmasked store.
    states_ref[...] = jnp.concatenate(
        [hid1, c1n, hid2, c2n], axis=1).astype(states_ref.dtype)


def wifi_lstm_step(x, h0, c0, h1, c1, prep):
    """Single module forward step (matches WifiLSTM_withLinear.forward)."""
    B, _ = x.shape
    H = h0.shape[1]
    C = prep["wout"].shape[1]

    vmem = pl.BlockSpec(memory_space=pltpu.MemorySpace.VMEM)
    kernel = functools.partial(wifi_lstm_step_kernel, hidden=H)

    out, states = pl.pallas_call(
        kernel,
        out_shape=(
            jax.ShapeDtypeStruct((B, C), jnp.float32),
            jax.ShapeDtypeStruct((B, 4 * H), jnp.float32),
        ),
        in_specs=[vmem] * 10,
        out_specs=(vmem, vmem),
    )(x, h0, c0, h1, c1,
      prep["w1"], prep["w2"], prep["b12"], prep["wout"], prep["bout"])

    hid1 = states[:, 0 * H:1 * H]
    c1n = states[:, 1 * H:2 * H]
    hid2 = states[:, 2 * H:3 * H]
    c2n = states[:, 3 * H:4 * H]
    return out, (hid1, c1n), (hid2, c2n)


# ----------------------------------------------------------------------------
# Sequence kernel: chunked time loop INSIDE the kernel, weights VMEM-resident
# ----------------------------------------------------------------------------
def wifi_lstm_seq_kernel(
    xs_ref, s0_ref, w1_ref, w2_ref, b12_ref, wout_ref, bout_ref,
    outs_ref, sfin_ref,
    state_sc, *, hidden, chunk,
):
    H = hidden
    tc = pl.program_id(0)

    # Initialize the VMEM-carried state slab on the first grid step only.
    @pl.when(tc == 0)
    def _():
        state_sc[...] = s0_ref[...]            # (B, 4H) = [h0 | c0 | h1 | c1]

    # Weights are resident in VMEM (constant index_maps -> single DMA for the
    # whole sequence).  Load them into values once per chunk so the unrolled
    # inner loop does not re-issue vector loads every iteration.
    w1 = w1_ref[...]
    w2 = w2_ref[...]
    b12 = b12_ref[...]
    wout = wout_ref[...]
    bout = bout_ref[...]

    s = state_sc[...]
    carry0 = (s[:, 0 * H:1 * H], s[:, 1 * H:2 * H],
              s[:, 2 * H:3 * H], s[:, 3 * H:4 * H])

    def body(tt, carry):
        h0, c0, h1, c1 = carry
        out, hid1, c1n, hid2, c2n = _lstm_forward(
            xs_ref[tt], h0, c0, h1, c1, w1, w2, b12, wout, bout, H)
        outs_ref[tt] = out.astype(outs_ref.dtype)   # VMEM store; one HBM DMA/chunk
        return (hid1, c1n, hid2, c2n)

    hid1, c1n, hid2, c2n = lax.fori_loop(0, chunk, body, carry0, unroll=True)

    # Carry the state to the next chunk and expose it as the lane-dense final
    # state output (constant index_map -> only the last write is DMA'd back).
    slab = jnp.concatenate([hid1, c1n, hid2, c2n], axis=1)
    state_sc[...] = slab
    sfin_ref[...] = slab.astype(sfin_ref.dtype)


def wifi_lstm_sequence(xs, h0, c0, h1, c1, prep, time_chunk=None):
    """Run the module over a whole sequence xs: (T, B, I) inside one kernel."""
    T, B, I = xs.shape
    H = h0.shape[1]
    C = prep["wout"].shape[1]

    if time_chunk is None:
        # Whole sequence in one chunk when small; otherwise the largest
        # divisor of T that keeps the unrolled inner loop / VMEM tile modest.
        time_chunk = T if T <= 32 else max(d for d in range(1, 33) if T % d == 0)
    assert T % time_chunk == 0, "time_chunk must divide T"
    n_chunks = T // time_chunk

    s0 = jnp.concatenate([h0, c0, h1, c1], axis=1)   # (B, 4H), built once
    kernel = functools.partial(wifi_lstm_seq_kernel, hidden=H, chunk=time_chunk)

    const = lambda shape: pl.BlockSpec(shape, lambda t: tuple(0 for _ in shape))

    grid_spec = pltpu.PrefetchScalarGridSpec(
        num_scalar_prefetch=0,
        grid=(n_chunks,),
        in_specs=[
            pl.BlockSpec((time_chunk, B, I), lambda t: (t, 0, 0)),  # xs streamed/chunk
            const(s0.shape),                                        # initial states
            const(prep["w1"].shape),                                # weights stay
            const(prep["w2"].shape),                                # resident in
            const(prep["b12"].shape),                               # VMEM (DMA'd
            const(prep["wout"].shape),                              # once for the
            const(prep["bout"].shape),                              # whole sequence)
        ],
        out_specs=[
            pl.BlockSpec((time_chunk, B, C), lambda t: (t, 0, 0)),  # logits/chunk
            const((B, 4 * H)),                                      # final states
        ],
        scratch_shapes=[pltpu.VMEM((B, 4 * H), jnp.float32)],       # h/c carry slab
    )

    outs, sfin = pl.pallas_call(
        kernel,
        out_shape=(
            jax.ShapeDtypeStruct((T, B, C), jnp.float32),
            jax.ShapeDtypeStruct((B, 4 * H), jnp.float32),
        ),
        grid_spec=grid_spec,
        compiler_params=pltpu.CompilerParams(
            dimension_semantics=("arbitrary",)),   # recurrence -> sequential
    )(xs, s0, prep["w1"], prep["w2"], prep["b12"], prep["wout"], prep["bout"])

    h1f = sfin[:, 0 * H:1 * H]
    c1f = sfin[:, 1 * H:2 * H]
    h2f = sfin[:, 2 * H:3 * H]
    c2f = sfin[:, 3 * H:4 * H]
    return outs, (h1f, c1f), (h2f, c2f)


# ----------------------------------------------------------------------------
# Parameter prep (done ONCE, hoisted out of the per-call path)
# ----------------------------------------------------------------------------
def prepare_params(params, compute_dtype=jnp.float32):
    """Pack PyTorch-layout params into the kernel layout.

    compute_dtype=jnp.bfloat16 halves weight DMA bytes and feeds the MXU at
    full rate on v6e/v7x; gate/cell math stays f32 inside the kernel.
    """
    w1 = jnp.concatenate([params["w_ih1"].T, params["w_hh1"].T], axis=0)  # (I+H, 4H)
    w2 = jnp.concatenate([params["w_ih2"].T, params["w_hh2"].T], axis=0)  # (2H, 4H)
    b12 = jnp.stack([params["b_ih1"] + params["b_hh1"],
                     params["b_ih2"] + params["b_hh2"]], axis=0)          # (2, 4H)
    wout = params["w_out"].T                                              # (H, C)
    bout = params["b_out"][None, :]                                       # (1, C)
    return {
        "w1": w1.astype(compute_dtype),
        "w2": w2.astype(compute_dtype),
        "b12": b12.astype(jnp.float32),
        "wout": wout.astype(compute_dtype),
        "bout": bout.astype(jnp.float32),
    }


def init_params(key, input_size, hidden_size, num_classes):
    """PyTorch-style uniform(-1/sqrt(H), 1/sqrt(H)) init."""
    ks = jax.random.split(key, 10)
    bound = 1.0 / jnp.sqrt(jnp.float32(hidden_size))
    u = lambda k, shape: jax.random.uniform(
        k, shape, jnp.float32, minval=-bound, maxval=bound)
    return {
        "w_ih1": u(ks[0], (4 * hidden_size, input_size)),
        "w_hh1": u(ks[1], (4 * hidden_size, hidden_size)),
        "b_ih1": u(ks[2], (4 * hidden_size,)),
        "b_hh1": u(ks[3], (4 * hidden_size,)),
        "w_ih2": u(ks[4], (4 * hidden_size, hidden_size)),
        "w_hh2": u(ks[5], (4 * hidden_size, hidden_size)),
        "b_ih2": u(ks[6], (4 * hidden_size,)),
        "b_hh2": u(ks[7], (4 * hidden_size,)),
        "w_out": u(ks[8], (num_classes, hidden_size)),
        "b_out": u(ks[9], (num_classes,)),
    }


def _reference(x, h0, c0, h1, c1, params):
    """Pure-JAX reference of the PyTorch forward."""
    H = h0.shape[1]

    def cell(x, h, c, w_ih, w_hh, b_ih, b_hh):
        g = x @ w_ih.T + b_ih + h @ w_hh.T + b_hh
        i = jax.nn.sigmoid(g[:, :H])
        f = jax.nn.sigmoid(g[:, H:2 * H])
        gg = jnp.tanh(g[:, 2 * H:3 * H])
        o = jax.nn.sigmoid(g[:, 3 * H:])
        c_new = f * c + i * gg
        return o * jnp.tanh(c_new), c_new

    hid1, c1n = cell(x, h0, c0, params["w_ih1"], params["w_hh1"],
                     params["b_ih1"], params["b_hh1"])
    hid2, c2n = cell(hid1, h1, c1, params["w_ih2"], params["w_hh2"],
                     params["b_ih2"], params["b_hh2"])
    out = hid2 @ params["w_out"].T + params["b_out"]
    return out, (hid1, c1n), (hid2, c2n)


if __name__ == "__main__":
    B = 2    # batch
    I = 16   # input_size
    H = 32   # hidden_size
    C = 8    # num_classes
    T = 8    # sequence length (for the in-kernel time-loop variant)

    key = jax.random.PRNGKey(0)
    k_x, k_h0, k_c0, k_h1, k_c1, k_p, k_xs = jax.random.split(key, 7)

    x = jax.random.normal(k_x, (B, I), jnp.float32)
    h0 = jax.random.normal(k_h0, (B, H), jnp.float32)
    c0 = jax.random.normal(k_c0, (B, H), jnp.float32)
    h1 = jax.random.normal(k_h1, (B, H), jnp.float32)
    c1 = jax.random.normal(k_c1, (B, H), jnp.float32)
    xs = jax.random.normal(k_xs, (T, B, I), jnp.float32)

    params = init_params(k_p, I, H, C)
    prep = prepare_params(params)          # packed once (f32 matmul operands)

    # ---- single step (module-faithful forward) ----
    out, (hid1, c1n), (hid2, c2n) = wifi_lstm_step(x, h0, c0, h1, c1, prep)
    jax.block_until_ready((out, hid1, c1n, hid2, c2n))

    r_out, (r_h1, r_c1), (r_h2, r_c2) = _reference(x, h0, c0, h1, c1, params)
    for a, b in [(out, r_out), (hid1, r_h1), (c1n, r_c1),
                 (hid2, r_h2), (c2n, r_c2)]:
        assert jnp.allclose(a, b, atol=1e-4, rtol=1e-4), "step mismatch vs reference"

    # ---- whole sequence inside one kernel (chunked time loop, VMEM-resident) ----
    outs, (h1f, c1f), (h2f, c2f) = wifi_lstm_sequence(xs, h0, c0, h1, c1, prep)
    jax.block_until_ready((outs, h1f, c1f, h2f, c2f))

    rh0, rc0, rh1, rc1 = h0, c0, h1, c1
    r_outs = []
    for t in range(T):
        r_out_t, (rh0, rc0), (rh1, rc1) = _reference(xs[t], rh0, rc0, rh1, rc1, params)
        r_outs.append(r_out_t)
    r_outs = jnp.stack(r_outs, axis=0)

    assert jnp.allclose(outs, r_outs, atol=1e-4, rtol=1e-4), "seq outputs mismatch"
    for a, b in [(h1f, rh0), (c1f, rc0), (h2f, rh1), (c2f, rc1)]:
        assert jnp.allclose(a, b, atol=1e-4, rtol=1e-4), "seq final-state mismatch"

    print("KERNEL_OK")
</pallas_src>

<mosaic_0001>
module attributes {stable_mosaic.version = 11 : i64} {
  func.func @wifi_lstm_step_kernel(%arg0: memref<2x16xf32, #tpu.memory_space<vmem>>, %arg1: memref<2x32xf32, #tpu.memory_space<vmem>>, %arg2: memref<2x32xf32, #tpu.memory_space<vmem>>, %arg3: memref<2x32xf32, #tpu.memory_space<vmem>>, %arg4: memref<2x32xf32, #tpu.memory_space<vmem>>, %arg5: memref<48x128xf32, #tpu.memory_space<vmem>>, %arg6: memref<64x128xf32, #tpu.memory_space<vmem>>, %arg7: memref<2x128xf32, #tpu.memory_space<vmem>>, %arg8: memref<32x8xf32, #tpu.memory_space<vmem>>, %arg9: memref<1x8xf32, #tpu.memory_space<vmem>>, %arg10: memref<2x8xf32, #tpu.memory_space<vmem>>, %arg11: memref<2x128xf32, #tpu.memory_space<vmem>>) attributes {dimension_semantics = [], scalar_prefetch = 0 : i64, scratch_operands = 0 : i64, tpu.core_type = #tpu.core_type<tc>} {
    %c0 = arith.constant 0 : index
    %c0_0 = arith.constant 0 : index
    %0 = vector.load %arg0[%c0, %c0_0] : memref<2x16xf32, #tpu.memory_space<vmem>>, vector<2x16xf32>
    %c0_1 = arith.constant 0 : index
    %c0_2 = arith.constant 0 : index
    %1 = vector.load %arg1[%c0_1, %c0_2] : memref<2x32xf32, #tpu.memory_space<vmem>>, vector<2x32xf32>
    %c0_3 = arith.constant 0 : index
    %c0_4 = arith.constant 0 : index
    %2 = vector.load %arg2[%c0_3, %c0_4] : memref<2x32xf32, #tpu.memory_space<vmem>>, vector<2x32xf32>
    %c0_5 = arith.constant 0 : index
    %c0_6 = arith.constant 0 : index
    %3 = vector.load %arg3[%c0_5, %c0_6] : memref<2x32xf32, #tpu.memory_space<vmem>>, vector<2x32xf32>
    %c0_7 = arith.constant 0 : index
    %c0_8 = arith.constant 0 : index
    %4 = vector.load %arg4[%c0_7, %c0_8] : memref<2x32xf32, #tpu.memory_space<vmem>>, vector<2x32xf32>
    %c0_9 = arith.constant 0 : index
    %c0_10 = arith.constant 0 : index
    %5 = vector.load %arg5[%c0_9, %c0_10] : memref<48x128xf32, #tpu.memory_space<vmem>>, vector<48x128xf32>
    %c0_11 = arith.constant 0 : index
    %c0_12 = arith.constant 0 : index
    %6 = vector.load %arg6[%c0_11, %c0_12] : memref<64x128xf32, #tpu.memory_space<vmem>>, vector<64x128xf32>
    %c0_13 = arith.constant 0 : index
    %c0_14 = arith.constant 0 : index
    %7 = vector.load %arg7[%c0_13, %c0_14] : memref<2x128xf32, #tpu.memory_space<vmem>>, vector<2x128xf32>
    %c0_15 = arith.constant 0 : index
    %c0_16 = arith.constant 0 : index
    %8 = vector.load %arg8[%c0_15, %c0_16] : memref<32x8xf32, #tpu.memory_space<vmem>>, vector<32x8xf32>
    %c0_17 = arith.constant 0 : index
    %c0_18 = arith.constant 0 : index
    %9 = vector.load %arg9[%c0_17, %c0_18] : memref<1x8xf32, #tpu.memory_space<vmem>>, vector<1x8xf32>
    %10 = tpu.concatenate %0, %1 in 1 : vector<2x16xf32>, vector<2x32xf32> -> vector<2x48xf32>
    %cst = arith.constant dense<0.000000e+00> : vector<2x128xf32>
    %11 = tpu.matmul %10, %5, %cst {dimension_numbers = #tpu.dot_dimension_numbers<[1], [0], [0], [1], [0, 0, 1, 1], [], []>} : vector<2x48xf32>, vector<48x128xf32>, vector<2x128xf32> -> vector<2x128xf32>
    %12 = vector.extract_strided_slice %7 {offsets = [0, 0], sizes = [1, 128], strides = [1, 1]} : vector<2x128xf32> to vector<1x128xf32>
    %13 = vector.broadcast %12 : vector<1x128xf32> to vector<2x128xf32>
    %14 = arith.addf %11, %13 : vector<2x128xf32>
    %15 = tpu.iota {dimensions = array<i32: 1>} : vector<2x128xi32>
    %c64_i32 = arith.constant 64 : i32
    %16 = vector.broadcast %c64_i32 : i32 to vector<2x128xi32>
    %17 = arith.cmpi sge, %15, %16 : vector<2x128xi32>
    %c96_i32 = arith.constant 96 : i32
    %18 = vector.broadcast %c96_i32 : i32 to vector<2x128xi32>
    %19 = arith.cmpi slt, %15, %18 : vector<2x128xi32>
    %20 = arith.andi %17, %19 : vector<2x128xi1>
    %21 = math.tanh %14 : vector<2x128xf32>
    %22 = arith.negf %14 : vector<2x128xf32>
    %23 = math.exp %22 : vector<2x128xf32>
    %cst_19 = arith.constant 1.000000e+00 : f32
    %24 = vector.broadcast %cst_19 : f32 to vector<2x128xf32>
    %25 = arith.addf %24, %23 : vector<2x128xf32>
    %26 = arith.divf %24, %25 : vector<2x128xf32>
    %27 = arith.select %20, %21, %26 : vector<2x128xi1>, vector<2x128xf32>
    %28 = vector.extract_strided_slice %27 {offsets = [0, 0], sizes = [2, 32], strides = [1, 1]} : vector<2x128xf32> to vector<2x32xf32>
    %29 = vector.extract_strided_slice %27 {offsets = [0, 32], sizes = [2, 32], strides = [1, 1]} : vector<2x128xf32> to vector<2x32xf32>
    %30 = vector.extract_strided_slice %27 {offsets = [0, 64], sizes = [2, 32], strides = [1, 1]} : vector<2x128xf32> to vector<2x32xf32>
    %31 = vector.extract_strided_slice %27 {offsets = [0, 96], sizes = [2, 32], strides = [1, 1]} : vector<2x128xf32> to vector<2x32xf32>
    %32 = arith.mulf %29, %2 : vector<2x32xf32>
    %33 = arith.mulf %28, %30 : vector<2x32xf32>
    %34 = arith.addf %32, %33 : vector<2x32xf32>
    %35 = math.tanh %34 : vector<2x32xf32>
    %36 = arith.mulf %31, %35 : vector<2x32xf32>
    %37 = tpu.concatenate %36, %3 in 1 : vector<2x32xf32>, vector<2x32xf32> -> vector<2x64xf32>
    %cst_20 = arith.constant dense<0.000000e+00> : vector<2x128xf32>
    %38 = tpu.matmul %37, %6, %cst_20 {dimension_numbers = #tpu.dot_dimension_numbers<[1], [0], [0], [1], [0, 0, 1, 1], [], []>} : vector<2x64xf32>, vector<64x128xf32>, vector<2x128xf32> -> vector<2x128xf32>
    %39 = vector.extract_strided_slice %7 {offsets = [1, 0], sizes = [1, 128], strides = [1, 1]} : vector<2x128xf32> to vector<1x128xf32>
    %40 = vector.broadcast %39 : vector<1x128xf32> to vector<2x128xf32>
    %41 = arith.addf %38, %40 : vector<2x128xf32>
    %42 = tpu.iota {dimensions = array<i32: 1>} : vector<2x128xi32>
    %c64_i32_21 = arith.constant 64 : i32
    %43 = vector.broadcast %c64_i32_21 : i32 to vector<2x128xi32>
    %44 = arith.cmpi sge, %42, %43 : vector<2x128xi32>
    %c96_i32_22 = arith.constant 96 : i32
    %45 = vector.broadcast %c96_i32_22 : i32 to vector<2x128xi32>
    %46 = arith.cmpi slt, %42, %45 : vector<2x128xi32>
    %47 = arith.andi %44, %46 : vector<2x128xi1>
    %48 = math.tanh %41 : vector<2x128xf32>
    %49 = arith.negf %41 : vector<2x128xf32>
    %50 = math.exp %49 : vector<2x128xf32>
    %cst_23 = arith.constant 1.000000e+00 : f32
    %51 = vector.broadcast %cst_23 : f32 to vector<2x128xf32>
    %52 = arith.addf %51, %50 : vector<2x128xf32>
    %53 = arith.divf %51, %52 : vector<2x128xf32>
    %54 = arith.select %47, %48, %53 : vector<2x128xi1>, vector<2x128xf32>
    %55 = vector.extract_strided_slice %54 {offsets = [0, 0], sizes = [2, 32], strides = [1, 1]} : vector<2x128xf32> to vector<2x32xf32>
    %56 = vector.extract_strided_slice %54 {offsets = [0, 32], sizes = [2, 32], strides = [1, 1]} : vector<2x128xf32> to vector<2x32xf32>
    %57 = vector.extract_strided_slice %54 {offsets = [0, 64], sizes = [2, 32], strides = [1, 1]} : vector<2x128xf32> to vector<2x32xf32>
    %58 = vector.extract_strided_slice %54 {offsets = [0, 96], sizes = [2, 32], strides = [1, 1]} : vector<2x128xf32> to vector<2x32xf32>
    %59 = arith.mulf %56, %4 : vector<2x32xf32>
    %60 = arith.mulf %55, %57 : vector<2x32xf32>
    %61 = arith.addf %59, %60 : vector<2x32xf32>
    %62 = math.tanh %61 : vector<2x32xf32>
    %63 = arith.mulf %58, %62 : vector<2x32xf32>
    %cst_24 = arith.constant dense<0.000000e+00> : vector<2x8xf32>
    %64 = tpu.matmul %63, %8, %cst_24 {dimension_numbers = #tpu.dot_dimension_numbers<[1], [0], [0], [1], [0, 0, 1, 1], [], []>} : vector<2x32xf32>, vector<32x8xf32>, vector<2x8xf32> -> vector<2x8xf32>
    %65 = vector.broadcast %9 : vector<1x8xf32> to vector<2x8xf32>
    %66 = arith.addf %64, %65 : vector<2x8xf32>
    %c0_25 = arith.constant 0 : index
    %c0_26 = arith.constant 0 : index
    %67 = vector.load %arg10[%c0_25, %c0_26] : memref<2x8xf32, #tpu.memory_space<vmem>>, vector<2x8xf32>
    tpu.vector_store %arg10[%c0_25, %c0_26], %66 {strides = array<i32>} : memref<2x8xf32, #tpu.memory_space<vmem>>, vector<2x8xf32>,
    %68 = tpu.concatenate %36, %34, %63, %61 in 1 : vector<2x32xf32>, vector<2x32xf32>, vector<2x32xf32>, vector<2x32xf32> -> vector<2x128xf32>
    %c0_27 = arith.constant 0 : index
    %c0_28 = arith.constant 0 : index
    %69 = vector.load %arg11[%c0_27, %c0_28] : memref<2x128xf32, #tpu.memory_space<vmem>>, vector<2x128xf32>
    tpu.vector_store %arg11[%c0_27, %c0_28], %68 {strides = array<i32>} : memref<2x128xf32, #tpu.memory_space<vmem>>, vector<2x128xf32>,
    return
  }
}

</mosaic_0001>

<bundles_post_ra>
// kernel: tpu_custom_call.1
= control target key start
LH: loop header
LB: loop body
LE: loop exit
PB: predicated region body
PF: predicated region fallthrough
CT: control target
= control target key end

     0   :  { %17 = vsyncpa [#allocation3], 0  ;;  %s936_s0 = inlined_call_operand.vmem [shape: f32[2,16], index: 0, kind: input, shape index: {}]   ;;  %s937_s1 = inlined_call_operand.vmem [shape: f32[2,32], index: 1, kind: input, shape index: {}]   ;;  %s938_s2 = inlined_call_operand.vmem [shape: f32[2,32], index: 2, kind: input, shape index: {}]   ;;  %s939_s3 = inlined_call_operand.hbm [shape: f32[2,32], index: 3, kind: input, shape index: {}]   ;;  %s940_s4 = inlined_call_operand.hbm [shape: f32[2,32], index: 4, kind: input, shape index: {}]   ;;  %s941_s5 = inlined_call_operand.vmem [shape: f32[48,128], index: 5, kind: input, shape index: {}]   ;;  %s942_s6 = inlined_call_operand.hbm [shape: f32[64,128], index: 6, kind: input, shape index: {}]   ;;  %s943_s7 = inlined_call_operand.vmem [shape: f32[2,128], index: 7, kind: input, shape index: {}]   ;;  %s944_s8 = inlined_call_operand.vmem [shape: f32[32,8], index: 8, kind: input, shape index: {}]   ;;  %s945_s9 = inlined_call_operand.vmem [shape: f32[1,8], index: 9, kind: input, shape index: {}]   ;;  %s946_s10 = inlined_call_operand.hbm [shape: f32[2,8], index: 10, kind: output, shape index: {0}]   ;;  %s947_s11 = inlined_call_operand.hbm [shape: f32[2,128], index: 11, kind: output, shape index: {1}]  }
   0x1   :  { %18 = vsyncpa [#allocation6], 0 }
   0x2   :  { %19 = vsyncpa [#allocation4], 0 }
   0x3   :  { %20 = vsyncpa [#allocation10], 0  ;;  %s708_s17 = smov [#allocation5]   ;;  %s709_s19 = smov [#allocation2]  }
   0x4   :  { %s43_s18 = sshll.u32 %s708_s17, 4  ;;  %s33_s20 = sshll.u32 %s709_s19, 4  ;;  %s44_s18 = int_to_ptr.vmem [resolvable:$true] %s43_s18  ;;  %s34_s20 = int_to_ptr.vmem [resolvable:$true] %s33_s20 }
   0x5   :  { %s590_s23 = scalar_lea.hbm %s940_s4, 32 }
   0x6   :  { %p591_p0 = scmp.ne.s32.totalorder %s940_s4, %s590_s23  ;;  %p594_p1 = scmp.lt.u32.totalorder %s590_s23, %s940_s4 }
   0x8   :  { %p596_p2 = pnand %p594_p1, %p591_p0 }
   0xa   :  { %599 = shalt.err (!%p596_p2)
}
   0xb   :  { %s600_s28 = scalar_lea.vmem %s44_s18, 32  ;;  %p605_p4 = scmp.lt.s32.totalorder %s44_s18, %s44_s18 }
   0xc   :  { %p601_p3 = scmp.ne.s32.totalorder %s44_s18, %s600_s28  ;;  %p606_p5 = scmp.lt.s32.totalorder %s600_s28, %s600_s28 }
   0xe   :  { %p607_p6 = por %p606_p5, %p605_p4 }
  0x10   :  { %p608_p7 = pnand %p607_p6, %p601_p3 }
  0x12   :  { %611 = shalt.err (!%p608_p7)
}
  0x13   :  { %46 = dma.hbm_to_vmem [thread:$0]  %s940_s4, 32, %s44_s18, [#allocation6]  }
  0x14   :  { %s612_s14 = scalar_lea.hbm %s939_s3, 32 }
  0x15   :  { %p613_p8 = scmp.ne.s32.totalorder %s939_s3, %s612_s14  ;;  %p616_p9 = scmp.lt.u32.totalorder %s612_s14, %s939_s3 }
  0x17   :  { %p618_p10 = pnand %p616_p9, %p613_p8 }
  0x19   :  { %621 = shalt.err (!%p618_p10)
}
  0x1a   :  { %s622_s21 = scalar_lea.vmem %s34_s20, 32  ;;  %p627_p12 = scmp.lt.s32.totalorder %s34_s20, %s34_s20 }
  0x1b   :  { %p623_p11 = scmp.ne.s32.totalorder %s34_s20, %s622_s21  ;;  %p628_p13 = scmp.lt.s32.totalorder %s622_s21, %s622_s21 }
  0x1d   :  { %p629_p0 = por %p628_p13, %p627_p12 }
  0x1f   :  { %p630_p1 = pnand %p629_p0, %p623_p11 }
  0x21   :  { %633 = shalt.err (!%p630_p1)
}
  0x22   :  { %36 = dma.hbm_to_vmem [thread:$0]  %s939_s3, 32, %s34_s20, [#allocation3]  }
  0x23   :  { %s710_s22 = smov [#allocation7]   ;;  %s634_s26 = scalar_lea.hbm %s942_s6, 1024 }
  0x24   :  { %s54_s23 = sshll.u32 %s710_s22, 4  ;;  %p635_p2 = scmp.ne.s32.totalorder %s942_s6, %s634_s26  ;;  %s55_s23 = int_to_ptr.vmem [resolvable:$true] %s54_s23 }
  0x25   :  { %p638_p3 = scmp.lt.u32.totalorder %s634_s26, %s942_s6 }
  0x27   :  { %p640_p4 = pnand %p638_p3, %p635_p2 }
  0x29   :  { %643 = shalt.err (!%p640_p4)
}
  0x2a   :  { %s644_s12 = scalar_lea.vmem %s55_s23, 1024  ;;  %p649_p6 = scmp.lt.s32.totalorder %s55_s23, %s55_s23 }
  0x2b   :  { %p645_p5 = scmp.ne.s32.totalorder %s55_s23, %s644_s12  ;;  %p650_p7 = scmp.lt.s32.totalorder %s644_s12, %s644_s12 }
  0x2d   :  { %p651_p8 = por %p650_p7, %p649_p6 }
  0x2f   :  { %p652_p9 = pnand %p651_p8, %p645_p5 }
  0x31   :  { %655 = shalt.err (!%p652_p9)
}
  0x32   :  { %s711_s3 = smov 128   ;;  %s712_s20 = smov 8  }
  0x33   :  { %60 = dma.hbm_to_vmem [thread:$0]  %s942_s6, 1024, %s55_s23, [#allocation6], %s711_s3, %s711_s3, %s712_s20  }
  0x34   :  { %700 = dma.done.wait [#allocation3], 32  }
  0x35   :  { %701 = vsyncadd [#allocation3], 4294967264 }
  0x36   :  { %702 = dma.done.wait [#allocation6], 1056  }
  0x37   :  { %703 = vsyncadd [#allocation6], 4294966240  ;;  %v713_v0 = vmov 0.0|0.0   ;;  %vm714_vm0 = vmmov 0   ;;  %v715_v1 = vmov 0.0   ;;  %v81_v3 = vld [vmem:[%s941_s5] sm:$0xff]  ;;  %v107_v16 = vlaneseq }
  0x38   :  { %533 = vmatprep.subr.bf16.mxu0 %v713_v0  ;;  %542 = vmatprep.subr.bf16.mxu1 %v713_v0  ;;  %v77_v2 = vld [vmem:[%s937_s1] sm:$0x3]  ;;  %v82_v4 = vld [vmem:[%s941_s5 + $0x8] sm:$0xff]  ;;  %s716_s4 = smov 16   ;;  %v83_v6 = vld [vmem:[%s941_s5 + $0x10] sm:$0xff]  ;;  %s717_s26 = smov 32  }
  0x39   :  { %500 = vmatprep.mubr.msk.f32.mxu0 %vm714_vm0, %v715_v1  ;;  %519 = vmatprep.mubr.msk.f32.mxu1 %vm714_vm0, %v715_v1  ;;  %v534_v5 = vpack.c.bf16 %v82_v4, %v81_v3  ;;  %v84_v7 = vld [vmem:[%s941_s5 + $0x18] sm:$0xff]  ;;  %v78_v8 = vld [vmem:[%s938_s2] sm:$0x3]  ;;  %v86_v11 = vld [vmem:[%s941_s5 + $0x28] sm:$0xff]  ;;  %vm105_vm1 = vcmask 130048   ;;  %vm111_vm2 = vcmask 392192  }
  0x3a   :  { %102 = vrot.lane.b32.xlu0 %v77_v2, %s716_s4  ;;  %v537_v9 = vpack.c.bf16 %v84_v7, %v83_v6  ;;  %199 = vrot.lane.b32.xlu1 %v78_v8, %s717_s26  ;;  %v85_v10 = vld [vmem:[%s941_s5 + $0x20] sm:$0xff]  ;;  %v854_v17 = vshrl.u32 %v107_v16, 7  ;;  %v186_v27 = vand.u32 127, %v107_v16  ;;  %v88_v39 = vld [vmem:[#allocation7 + $0x8] sm:$0xff]  ;;  %v89_v40 = vld [vmem:[#allocation7 + $0x10] sm:$0xff]  ;;  %vm227_vm6 = vcmask 261120  }
  0x3b   :  { %535 = vmatpush3.bf16.msra.mxu0 %v534_v5  ;;  %v540_v12 = vpack.c.bf16 %v86_v11, %v85_v10  ;;  %v76_v13 = vld [vmem:[%s936_s0] sm:$0x3]  ;;  %s718_s0 = smov 64   ;;  %v87_v38 = vld [vmem:[#allocation7] sm:$0xff]  ;;  %v92_v45 = vld [vmem:[#allocation7 + $0x28] sm:$0xff]  ;;  %vm233_vm7 = vcmask 523264  }
  0x3c   :  { %536 = vmatprep.subr.bf16.mxu0 %v713_v0  ;;  %v109_v18 = vsub.s32 0, %v854_v17  ;;  %v860_v19 = vld [vmem:[%s943_s7] sm:$0x3]  ;;  %vm187_vm3 = vcmp.ge.s32.totalorder %v186_v27, 64  ;;  %vm188_vm4 = vcmp.lt.s32.totalorder %v186_v27, 96  ;;  %v543_v41 = vpack.c.bf16 %v88_v39, %v87_v38  ;;  %v91_v44 = vld [vmem:[#allocation7 + $0x20] sm:$0xff] }
  0x3d   :  { %vm863_vm5 = vmand %vm187_vm3, %vm188_vm4  ;;  %v90_v42 = vld [vmem:[#allocation7 + $0x18] sm:$0xff]  ;;  %v549_v46 = vpack.c.bf16 %v92_v45, %v91_v44  ;;  %v93_v47 = vld [vmem:[#allocation7 + $0x30] sm:$0xff]  ;;  %v231_v58 = vsub.s32 1, %v854_v17  ;;  %s719_s19 = smov 96   ;;  %vm428_vm8 = vcmask 785408  }
  0x3e   :  { %v110_v20 = vrot.slane %v860_v19, %v109_v18  ;;  %544 = vmatpush3.bf16.msra.mxu1 %v543_v41  ;;  %v546_v43 = vpack.c.bf16 %v90_v42, %v89_v40  ;;  %v94_v48 = vld [vmem:[#allocation7 + $0x38] sm:$0xff] }
  0x3f   :  { %538 = vmatpush3.bf16.msra.mxu0 %v537_v9  ;;  %545 = vmatprep.subr.bf16.mxu1 %v713_v0  ;;  %v552_v50 = vpack.c.bf16 %v94_v48, %v93_v47  ;;  %v79_v51 = vld [vmem:[#allocation2] sm:$0x3]  ;;  %v80_v52 = vld [vmem:[#allocation5] sm:$0x3]  ;;  %v232_v59 = vrot.slane %v860_v19, %v231_v58  ;;  %v99_v16 = vld [vmem:[%s944_s8 + $0x18] sm:$0xff] }
  0x40   :  { %539 = vmatprep.subr.bf16.mxu0 %v713_v0 }
  0x42   :  { %547 = vmatpush3.bf16.msra.mxu1 %v546_v43 }
  0x43   :  { %541 = vmatpush3.bf16.msra.mxu0 %v540_v12  ;;  %548 = vmatprep.subr.bf16.mxu1 %v713_v0  ;;  %v96_v12 = vld [vmem:[%s944_s8] sm:$0xff] }
  0x44   :  { %554 = vmatprep.subr.bf16.mxu0 %v713_v0 }
  0x46   :  { %550 = vmatpush3.bf16.msra.mxu1 %v549_v46 }
  0x47   :  { %551 = vmatprep.subr.bf16.mxu1 %v713_v0 }
  0x4a   :  { %553 = vmatpush3.bf16.msra.mxu1 %v552_v50 }
  0xac   :  { %v103_v14 = vpop.permute.xlu0 %102  ;;  %v200_v34 = vpop.permute.xlu1 %199 }
  0xad   :  { %v106_v15 = vsel %vm105_vm1, %v76_v13, %v103_v14  ;;  %v97_v13 = vld [vmem:[%s944_s8 + $0x8] sm:$0xff]  ;;  %v98_v14 = vld [vmem:[%s944_s8 + $0x10] sm:$0xff]  ;;  %s720_s8 = smov [#allocation9]  }
  0xae   :  { %501 = vmatmul.mubr.msk.f32.vlgmr.msra.gmra.mrb[0].mxu0 %vm111_vm2, %v106_v15  ;;  %v555_v15 = vpack.c.bf16 %v97_v13, %v96_v12  ;;  %v558_v17 = vpack.c.bf16 %v99_v16, %v98_v14  ;;  %s447_s21 = sshll.u32 %s720_s8, 4  ;;  %s448_s21 = int_to_ptr.vmem [resolvable:$true] %s447_s21 }
  0xaf   :  { %530 = vmatprep.mubr.msk.f32.mxu0 %vm714_vm0, %v715_v1  ;;  %s656_s4 = scalar_lea.vmem %s448_s21, 32  ;;  %p661_p11 = scmp.lt.s32.totalorder %s448_s21, %s448_s21 }
  0xb0   :  { %556 = vmatpush3.bf16.msra.mxu0 %v555_v15  ;;  %p657_p10 = scmp.ne.s32.totalorder %s448_s21, %s656_s4  ;;  %p662_p12 = scmp.lt.s32.totalorder %s656_s4, %s656_s4 }
  0xb1   :  { %557 = vmatprep.subr.bf16.mxu0 %v713_v0 }
  0xb2   :  { %p663_p13 = por %p662_p12, %p661_p11 }
  0xb4   :  { %559 = vmatpush3.bf16.msra.mxu0 %v558_v17  ;;  %p664_p0 = pnand %p663_p13, %p657_p10 }
 0x181   :  { %v181_v21 = vpop.f32.mrb[0].mxu0 }
 0x182   :  { %v182_v22 = vadd.f32 %v181_v21, %v110_v20  ;;  %v502_v23 = vpop.f32.mrb[1].mxu0 }
 0x184   :  { %v462_v24 = vmul.f32 -1.442695, %v182_v22 }
 0x186   :  { %574 = vpow2.f32 %v462_v24 }
 0x187   :  { %576 = vtanh.f32 %v182_v22 }
 0x190   :  { %v575_v25 = vpop.eup %574 }
 0x191   :  { %v194_v26 = vadd.f32 1.0, %v575_v25  ;;  %v577_v29 = vpop.eup %576 }
 0x193   :  { %578 = vrcp.f32 %v194_v26 }
 0x19d   :  { %v579_v30 = vpop.eup %578 }
 0x19e   :  { %v197_v31 = vsel %vm863_vm5, %v577_v29, %v579_v30 }
 0x19f   :  { %204 = vrot.lane.b32.xlu0 %v197_v31, %s718_s0  ;;  %v202_v35 = vmul.f32 %v200_v34, %v197_v31 }
 0x211   :  { %v205_v32 = vpop.permute.xlu0 %204 }
 0x212   :  { %v207_v33 = vmul.f32 %v205_v32, %v197_v31 }
 0x214   :  { %209 = vrot.lane.b32.xlu1 %v207_v33, %s717_s26 }
 0x286   :  { %v210_v36 = vpop.permute.xlu1 %209 }
 0x287   :  { %v871_v37 = vadd.f32 %v210_v36, %v202_v35 }
 0x289   :  { %580 = vtanh.f32 %v871_v37 }
 0x293   :  { %v581_v49 = vpop.eup %580 }
 0x294   :  { %215 = vrot.lane.b32.xlu0 %v581_v49, %s718_s0 }
 0x298   :  { %224 = vrot.lane.b32.xlu0 %v79_v51, %s717_s26 }
 0x29c   :  { %316 = vrot.lane.b32.xlu0 %v80_v52, %s717_s26 }
 0x306   :  { %v216_v53 = vpop.permute.xlu0 %215 }
 0x307   :  { %v218_v54 = vmul.f32 %v216_v53, %v197_v31 }
 0x309   :  { %220 = vrot.lane.b32.xlu1 %v218_v54, %s717_s26 }
 0x30a   :  { %v225_v55 = vpop.permute.xlu0 %224 }
 0x30e   :  { %v317_v8 = vpop.permute.xlu0 %316 }
 0x37b   :  { %v221_v56 = vpop.permute.xlu1 %220 }
 0x37c   :  { %v228_v57 = vsel %vm227_vm6, %v221_v56, %v225_v55  ;;  %v426_v0 = vsel %vm227_vm6, %v221_v56, %v871_v37 }
 0x37d   :  { %520 = vmatmul.mubr.msk.f32.vlgmr.msra.gmra.mrb[0].mxu1 %vm233_vm7, %v228_v57 }
 0x450   :  { %v303_v60 = vpop.f32.mrb[0].mxu1 }
 0x451   :  { %v304_v61 = vadd.f32 %v303_v60, %v232_v59  ;;  %v521_v62 = vpop.f32.mrb[1].mxu1 }
 0x453   :  { %v464_v63 = vmul.f32 -1.442695, %v304_v61 }
 0x455   :  { %582 = vpow2.f32 %v464_v63 }
 0x456   :  { %584 = vtanh.f32 %v304_v61 }
 0x45f   :  { %v583_v1 = vpop.eup %582 }
 0x460   :  { %v311_v2 = vadd.f32 1.0, %v583_v1  ;;  %v585_v3 = vpop.eup %584 }
 0x462   :  { %586 = vrcp.f32 %v311_v2 }
 0x46c   :  { %v587_v4 = vpop.eup %586 }
 0x46d   :  { %v314_v5 = vsel %vm863_vm5, %v585_v3, %v587_v4 }
 0x46e   :  { %321 = vrot.lane.b32.xlu1 %v314_v5, %s718_s0  ;;  %v319_v9 = vmul.f32 %v317_v8, %v314_v5 }
 0x4e0   :  { %v322_v6 = vpop.permute.xlu1 %321 }
 0x4e1   :  { %v324_v7 = vmul.f32 %v322_v6, %v314_v5 }
 0x4e3   :  { %326 = vrot.lane.b32.xlu1 %v324_v7, %s717_s26 }
 0x555   :  { %v327_v10 = vpop.permute.xlu1 %326 }
 0x556   :  { %v329_v11 = vadd.f32 %v327_v10, %v319_v9 }
 0x558   :  { %588 = vtanh.f32 %v329_v11 }
 0x562   :  { %v589_v18 = vpop.eup %588 }
 0x563   :  { %332 = vrot.lane.b32.xlu0 %v589_v18, %s718_s0 }
 0x5d5   :  { %v333_v19 = vpop.permute.xlu0 %332 }
 0x5d6   :  { %v335_v20 = vmul.f32 %v333_v19, %v314_v5 }
 0x5d8   :  { %419 = vrot.lane.b32.xlu0 %v335_v20, %s719_s19  ;;  %343 = vrot.lane.b32.xlu1 %v335_v20, %s717_s26 }
 0x5dc   :  { %423 = vrot.lane.b32.xlu1 %v329_v11, %s718_s0 }
 0x64a   :  { %v344_v21 = vpop.permute.xlu1 %343  ;;  %v420_v22 = vpop.permute.xlu0 %419 }
 0x64b   :  { %531 = vmatmul.mubr.msk.f32.vlgmr.msra.gmra.mrb[2].mxu0 %vm227_vm6, %v344_v21  ;;  %v427_v23 = vsel %vm233_vm7, %v426_v0, %v420_v22 }
 0x64e   :  { %v424_v24 = vpop.permute.xlu1 %423 }
 0x64f   :  { %v429_v25 = vsel %vm428_vm8, %v427_v23, %v424_v24 }
 0x650   :  { %430 = vst [vmem:[#allocation9] sm:$0x3] %v429_v25 }
 0x651   :  { %667 = shalt.err (!%p664_p0)
}
 0x652   :  { %s668_s23 = scalar_lea.hbm %s947_s11, 32 }
 0x653   :  { %p669_p1 = scmp.ne.s32.totalorder %s947_s11, %s668_s23  ;;  %p672_p2 = scmp.lt.u32.totalorder %s668_s23, %s947_s11 }
 0x655   :  { %p674_p3 = pnand %p672_p2, %p669_p1 }
 0x657   :  { %677 = shalt.err (!%p674_p3)
}
 0x658   :  { %450 = dma.vmem_to_hbm [thread:$0]  %s448_s21, 32, %s947_s11, [#allocation10]   ;;  %v465_v26 = vld [vmem:[%s945_s9] ss:$0 sm:$0xff]  ;;  %vm417_vm9 = vcmask 58368  }
 0x659   :  { %s721_s2 = smov [#allocation8]  }
 0x65a   :  { %s437_s12 = sshll.u32 %s721_s2, 4  ;;  %s438_s12 = int_to_ptr.vmem [resolvable:$true] %s437_s12 }
 0x65b   :  { %s678_s5 = scalar_lea.vmem %s438_s12, 32  ;;  %p683_p5 = scmp.lt.s32.totalorder %s438_s12, %s438_s12 }
 0x65c   :  { %p679_p4 = scmp.ne.s32.totalorder %s438_s12, %s678_s5  ;;  %p684_p6 = scmp.lt.s32.totalorder %s678_s5, %s678_s5 }
 0x65e   :  { %p685_p7 = por %p684_p6, %p683_p5 }
 0x660   :  { %p686_p8 = pnand %p685_p7, %p679_p4 }
 0x71e   :  { %v413_v27 = vpop.f32.mrb[2].mxu0 }
 0x71f   :  { %v414_v28 = vadd.f32 %v465_v26, %v413_v27  ;;  %v532_v29 = vpop.f32.mrb[3].mxu0 }
 0x721   :  { %418 = vst.msk [vmem:[#allocation8] sm:$0x3] %vm417_vm9, %v414_v28 }
 0x722   :  { %689 = shalt.err (!%p686_p8)
}
 0x723   :  { %s690_s0 = scalar_lea.hbm %s946_s10, 32 }
 0x724   :  { %p691_p9 = scmp.ne.s32.totalorder %s946_s10, %s690_s0  ;;  %p694_p10 = scmp.lt.u32.totalorder %s690_s0, %s946_s10 }
 0x726   :  { %p696_p11 = pnand %p694_p10, %p691_p9 }
 0x728   :  { %699 = shalt.err (!%p696_p11)
}
 0x729   :  { %440 = dma.vmem_to_hbm [thread:$0]  %s438_s12, 32, %s946_s10, [#allocation4]  }
 0x72a   :  { %704 = dma.done.wait [#allocation4], 32  }
 0x72b   :  { %705 = vsyncadd [#allocation4], 4294967264 }
 0x72c   :  { %706 = dma.done.wait [#allocation10], 32  }
 0x72d   :  { %707 = vsyncadd [#allocation10], 4294967264 }
 0x72e   :  { %457 = vsyncpa [#allocation3], 1 }
 0x72f   :  { %458 = vsyncpa [#allocation6], 1 }
 0x730   :  { %459 = vsyncpa [#allocation4], 1 }
 0x731   :  { %460 = vsyncpa [#allocation10], 1 }

</bundles_post_ra>
